<compile_context>
chip_gen: v6e
topology: v6e:2x2x1
jax: 0.10.0
libtpu: 0.0.40
codegen_flags: <defaults>
</compile_context>

<pallas_src>
import functools

import jax
import jax.numpy as jnp
from jax.experimental import pallas as pl
from jax.experimental.pallas import tpu as pltpu

KH, KW = 3, 3  # conv kernel size (static)


def _lane_shift(x, d):
    """shifted[..., p] = x[..., (p + d) % n] along the last (lane) axis.

    Spelled out as slice + lane-concatenate (the same decomposition jnp.roll
    uses); Mosaic executes the lane shuffles on the XLU, off the MXU/VPU path.
    """
    n = x.shape[-1]
    s = d % n
    if s == 0:
        return x
    return jnp.concatenate([x[..., s:], x[..., :s]], axis=-1)


def _conv3x3_kernel(x_ref, w_ref, b_ref, o_ref, *, H, W, compute_dtype):
    """One image per grid step.

    x_ref: (1, Cin, H*W)      flattened NCHW input, spatial on lanes (VMEM)
    w_ref: (Cout, KH*KW*Cin)  im2col weight matrix, tap-major / cin-minor (VMEM)
    b_ref: (Cout, 1)          bias (VMEM)
    o_ref: (1, Cout, H*W)     output, spatial on lanes (lane-dense store)
    """
    Ci = x_ref.shape[1]
    HW = H * W

    x = x_ref[0]  # (Cin, HW)

    # Flat-spatial coordinate of every lane, for the "same"-padding masks.
    lane = jax.lax.broadcasted_iota(jnp.int32, (Ci, HW), dimension=1)
    if W & (W - 1) == 0:            # power-of-two W: pure bit ops on the VPU
        w_shift = W.bit_length() - 1
        row = lane >> w_shift
        col = lane & (W - 1)
    else:
        row = lane // W
        col = lane % W

    # im2col: build the (KH*KW*Cin, HW) patch matrix with lane shifts + masks.
    taps = []
    for kh in range(KH):
        for kw in range(KW):
            dh, dw = kh - 1, kw - 1
            tap = _lane_shift(x, dh * W + dw)
            conds = []
            if dh < 0:
                conds.append(row >= -dh)
            elif dh > 0:
                conds.append(row < H - dh)
            if dw < 0:
                conds.append(col >= -dw)
            elif dw > 0:
                conds.append(col < W - dw)
            if conds:
                valid = conds[0]
                for c in conds[1:]:
                    valid = valid & c
                tap = jnp.where(valid, tap, 0.0)
            taps.append(tap)
    patches = jnp.concatenate(taps, axis=0)  # (KH*KW*Cin, HW)

    # Single fused MXU matmul: (Cout, 27) x (27, HW) -> (Cout, HW), N on lanes.
    lhs = w_ref[...]
    rhs = patches
    if compute_dtype is not None:            # e.g. jnp.bfloat16 on v6e / v7x
        lhs = lhs.astype(compute_dtype)
        rhs = rhs.astype(compute_dtype)
    acc = jnp.dot(lhs, rhs, preferred_element_type=jnp.float32)
    acc = acc + b_ref[...]                   # (Cout, 1) broadcasts across lanes
    o_ref[0] = acc.astype(o_ref.dtype)


def conv2d_3x3_pallas(x_nchw, weight, bias, *, compute_dtype=None):
    """Forward of nn.Conv2d(Cin, Cout, 3, padding=1, stride=1).

    x_nchw: (B, Cin, H, W); weight: (Cout, Cin, 3, 3); bias: (Cout,).
    Returns (B, Cout, H, W).
    """
    B, Ci, H, W = x_nchw.shape
    Co, Ci_w, kh, kw = weight.shape
    assert (kh, kw) == (KH, KW) and Ci_w == Ci
    HW = H * W

    # Pure-reshape glue: no pads, no transposes of the activation tensor.
    x_flat = x_nchw.reshape(B, Ci, HW)
    # Weight -> (Cout, KH*KW*Cin); flat index (kh*KW + kw)*Cin + ci matches the
    # tap-major / cin-minor concatenation order inside the kernel.
    w_mat = jnp.transpose(weight, (0, 2, 3, 1)).reshape(Co, KH * KW * Ci)
    b2d = bias.reshape(Co, 1)

    kernel = functools.partial(
        _conv3x3_kernel, H=H, W=W, compute_dtype=compute_dtype)

    out_flat = pl.pallas_call(
        kernel,
        out_shape=jax.ShapeDtypeStruct((B, Co, HW), x_nchw.dtype),
        grid_spec=pltpu.PrefetchScalarGridSpec(
            num_scalar_prefetch=0,
            grid=(B,),
            in_specs=[
                pl.BlockSpec((1, Ci, HW), lambda b: (b, 0, 0)),
                pl.BlockSpec((Co, KH * KW * Ci), lambda b: (0, 0)),
                pl.BlockSpec((Co, 1), lambda b: (0, 0)),
            ],
            out_specs=pl.BlockSpec((1, Co, HW), lambda b: (b, 0, 0)),
        ),
        compiler_params=pltpu.CompilerParams(
            dimension_semantics=("parallel",),
            vmem_limit_bytes=32 * 1024 * 1024,
        ),
    )(x_flat, w_mat, b2d)

    return out_flat.reshape(B, Co, H, W)


def reference_conv(x_nchw, weight, bias):
    # Pure-JAX reference for correctness check.
    out = jax.lax.conv_general_dilated(
        x_nchw, weight, window_strides=(1, 1), padding=((1, 1), (1, 1)),
        dimension_numbers=("NCHW", "OIHW", "NCHW"))
    return out + bias[None, :, None, None]


if __name__ == "__main__":
    key = jax.random.PRNGKey(0)
    k_x, k_w, k_b = jax.random.split(key, 3)

    B, Cin, H, W = 2, 3, 16, 16
    Cout = 16

    x = jax.random.normal(k_x, (B, Cin, H, W), dtype=jnp.float32)

    # Deterministic parameter init (Kaiming-uniform-like bounds, as in nn.Conv2d).
    fan_in = Cin * KH * KW
    bound = 1.0 / jnp.sqrt(float(fan_in))
    weight = jax.random.uniform(k_w, (Cout, Cin, KH, KW),
                                minval=-bound, maxval=bound, dtype=jnp.float32)
    bias = jax.random.uniform(k_b, (Cout,),
                              minval=-bound, maxval=bound, dtype=jnp.float32)

    conv = jax.jit(conv2d_3x3_pallas)
    out = conv(x, weight, bias)
    out = jax.block_until_ready(out)

    ref = reference_conv(x, weight, bias)
    assert out.shape == (B, Cout, H, W), out.shape
    assert jnp.allclose(out, ref, atol=1e-4, rtol=1e-4), "mismatch vs reference"

    print("KERNEL_OK")
</pallas_src>

<mosaic_0001>
module attributes {stable_mosaic.version = 11 : i64} {
  func.func @_conv3x3_kernel(%arg0: i32, %arg1: memref<1x3x256xf32, #tpu.memory_space<vmem>>, %arg2: memref<16x27xf32, #tpu.memory_space<vmem>>, %arg3: memref<16x1xf32, #tpu.memory_space<vmem>>, %arg4: memref<1x16x256xf32, #tpu.memory_space<vmem>>) attributes {dimension_semantics = [#tpu.dimension_semantics<parallel>], iteration_bounds = array<i64: 2>, scalar_prefetch = 0 : i64, scratch_operands = 0 : i64, tpu.core_type = #tpu.core_type<tc>, window_params = [{transform_indices = @transform_0, window_bounds = array<i64: 1, 3, 256>}, {pipeline_mode = #tpu.pipeline_mode<synchronous>, transform_indices = @transform_1, window_bounds = array<i64: 16, 27>}, {pipeline_mode = #tpu.pipeline_mode<synchronous>, transform_indices = @transform_2, window_bounds = array<i64: 16, 1>}, {transform_indices = @transform_3, window_bounds = array<i64: 1, 16, 256>}]} {
    %c0 = arith.constant 0 : index
    %c0_0 = arith.constant 0 : index
    %c0_1 = arith.constant 0 : index
    %0 = vector.load %arg1[%c0, %c0_0, %c0_1] : memref<1x3x256xf32, #tpu.memory_space<vmem>>, vector<1x3x256xf32>
    %1 = vector.shape_cast %0 : vector<1x3x256xf32> to vector<3x256xf32>
    %2 = tpu.iota {dimensions = array<i32: 1>} : vector<3x256xi32>
    %c4_i32 = arith.constant 4 : i32
    %3 = vector.broadcast %c4_i32 : i32 to vector<3x256xi32>
    %4 = arith.shrsi %2, %3 : vector<3x256xi32>
    %c15_i32 = arith.constant 15 : i32
    %5 = vector.broadcast %c15_i32 : i32 to vector<3x256xi32>
    %6 = arith.andi %2, %5 : vector<3x256xi32>
    %7 = vector.extract_strided_slice %1 {offsets = [0, 239], sizes = [3, 17], strides = [1, 1]} : vector<3x256xf32> to vector<3x17xf32>
    %8 = vector.extract_strided_slice %1 {offsets = [0, 0], sizes = [3, 239], strides = [1, 1]} : vector<3x256xf32> to vector<3x239xf32>
    %9 = tpu.concatenate %7, %8 in 1 : vector<3x17xf32>, vector<3x239xf32> -> vector<3x256xf32>
    %c1_i32 = arith.constant 1 : i32
    %10 = vector.broadcast %c1_i32 : i32 to vector<3x256xi32>
    %11 = arith.cmpi sge, %4, %10 : vector<3x256xi32>
    %c1_i32_2 = arith.constant 1 : i32
    %12 = vector.broadcast %c1_i32_2 : i32 to vector<3x256xi32>
    %13 = arith.cmpi sge, %6, %12 : vector<3x256xi32>
    %14 = arith.andi %11, %13 : vector<3x256xi1>
    %cst = arith.constant 0.000000e+00 : f32
    %15 = vector.broadcast %cst : f32 to vector<3x256xf32>
    %16 = arith.select %14, %9, %15 : vector<3x256xi1>, vector<3x256xf32>
    %17 = vector.extract_strided_slice %1 {offsets = [0, 240], sizes = [3, 16], strides = [1, 1]} : vector<3x256xf32> to vector<3x16xf32>
    %18 = vector.extract_strided_slice %1 {offsets = [0, 0], sizes = [3, 240], strides = [1, 1]} : vector<3x256xf32> to vector<3x240xf32>
    %19 = tpu.concatenate %17, %18 in 1 : vector<3x16xf32>, vector<3x240xf32> -> vector<3x256xf32>
    %c1_i32_3 = arith.constant 1 : i32
    %20 = vector.broadcast %c1_i32_3 : i32 to vector<3x256xi32>
    %21 = arith.cmpi sge, %4, %20 : vector<3x256xi32>
    %cst_4 = arith.constant 0.000000e+00 : f32
    %22 = vector.broadcast %cst_4 : f32 to vector<3x256xf32>
    %23 = arith.select %21, %19, %22 : vector<3x256xi1>, vector<3x256xf32>
    %24 = vector.extract_strided_slice %1 {offsets = [0, 241], sizes = [3, 15], strides = [1, 1]} : vector<3x256xf32> to vector<3x15xf32>
    %25 = vector.extract_strided_slice %1 {offsets = [0, 0], sizes = [3, 241], strides = [1, 1]} : vector<3x256xf32> to vector<3x241xf32>
    %26 = tpu.concatenate %24, %25 in 1 : vector<3x15xf32>, vector<3x241xf32> -> vector<3x256xf32>
    %c1_i32_5 = arith.constant 1 : i32
    %27 = vector.broadcast %c1_i32_5 : i32 to vector<3x256xi32>
    %28 = arith.cmpi sge, %4, %27 : vector<3x256xi32>
    %c15_i32_6 = arith.constant 15 : i32
    %29 = vector.broadcast %c15_i32_6 : i32 to vector<3x256xi32>
    %30 = arith.cmpi slt, %6, %29 : vector<3x256xi32>
    %31 = arith.andi %28, %30 : vector<3x256xi1>
    %cst_7 = arith.constant 0.000000e+00 : f32
    %32 = vector.broadcast %cst_7 : f32 to vector<3x256xf32>
    %33 = arith.select %31, %26, %32 : vector<3x256xi1>, vector<3x256xf32>
    %34 = vector.extract_strided_slice %1 {offsets = [0, 255], sizes = [3, 1], strides = [1, 1]} : vector<3x256xf32> to vector<3x1xf32>
    %35 = vector.extract_strided_slice %1 {offsets = [0, 0], sizes = [3, 255], strides = [1, 1]} : vector<3x256xf32> to vector<3x255xf32>
    %36 = tpu.concatenate %34, %35 in 1 : vector<3x1xf32>, vector<3x255xf32> -> vector<3x256xf32>
    %c1_i32_8 = arith.constant 1 : i32
    %37 = vector.broadcast %c1_i32_8 : i32 to vector<3x256xi32>
    %38 = arith.cmpi sge, %6, %37 : vector<3x256xi32>
    %cst_9 = arith.constant 0.000000e+00 : f32
    %39 = vector.broadcast %cst_9 : f32 to vector<3x256xf32>
    %40 = arith.select %38, %36, %39 : vector<3x256xi1>, vector<3x256xf32>
    %41 = vector.extract_strided_slice %1 {offsets = [0, 1], sizes = [3, 255], strides = [1, 1]} : vector<3x256xf32> to vector<3x255xf32>
    %42 = vector.extract_strided_slice %1 {offsets = [0, 0], sizes = [3, 1], strides = [1, 1]} : vector<3x256xf32> to vector<3x1xf32>
    %43 = tpu.concatenate %41, %42 in 1 : vector<3x255xf32>, vector<3x1xf32> -> vector<3x256xf32>
    %c15_i32_10 = arith.constant 15 : i32
    %44 = vector.broadcast %c15_i32_10 : i32 to vector<3x256xi32>
    %45 = arith.cmpi slt, %6, %44 : vector<3x256xi32>
    %cst_11 = arith.constant 0.000000e+00 : f32
    %46 = vector.broadcast %cst_11 : f32 to vector<3x256xf32>
    %47 = arith.select %45, %43, %46 : vector<3x256xi1>, vector<3x256xf32>
    %48 = vector.extract_strided_slice %1 {offsets = [0, 15], sizes = [3, 241], strides = [1, 1]} : vector<3x256xf32> to vector<3x241xf32>
    %49 = vector.extract_strided_slice %1 {offsets = [0, 0], sizes = [3, 15], strides = [1, 1]} : vector<3x256xf32> to vector<3x15xf32>
    %50 = tpu.concatenate %48, %49 in 1 : vector<3x241xf32>, vector<3x15xf32> -> vector<3x256xf32>
    %c15_i32_12 = arith.constant 15 : i32
    %51 = vector.broadcast %c15_i32_12 : i32 to vector<3x256xi32>
    %52 = arith.cmpi slt, %4, %51 : vector<3x256xi32>
    %c1_i32_13 = arith.constant 1 : i32
    %53 = vector.broadcast %c1_i32_13 : i32 to vector<3x256xi32>
    %54 = arith.cmpi sge, %6, %53 : vector<3x256xi32>
    %55 = arith.andi %52, %54 : vector<3x256xi1>
    %cst_14 = arith.constant 0.000000e+00 : f32
    %56 = vector.broadcast %cst_14 : f32 to vector<3x256xf32>
    %57 = arith.select %55, %50, %56 : vector<3x256xi1>, vector<3x256xf32>
    %58 = vector.extract_strided_slice %1 {offsets = [0, 16], sizes = [3, 240], strides = [1, 1]} : vector<3x256xf32> to vector<3x240xf32>
    %59 = vector.extract_strided_slice %1 {offsets = [0, 0], sizes = [3, 16], strides = [1, 1]} : vector<3x256xf32> to vector<3x16xf32>
    %60 = tpu.concatenate %58, %59 in 1 : vector<3x240xf32>, vector<3x16xf32> -> vector<3x256xf32>
    %c15_i32_15 = arith.constant 15 : i32
    %61 = vector.broadcast %c15_i32_15 : i32 to vector<3x256xi32>
    %62 = arith.cmpi slt, %4, %61 : vector<3x256xi32>
    %cst_16 = arith.constant 0.000000e+00 : f32
    %63 = vector.broadcast %cst_16 : f32 to vector<3x256xf32>
    %64 = arith.select %62, %60, %63 : vector<3x256xi1>, vector<3x256xf32>
    %65 = vector.extract_strided_slice %1 {offsets = [0, 17], sizes = [3, 239], strides = [1, 1]} : vector<3x256xf32> to vector<3x239xf32>
    %66 = vector.extract_strided_slice %1 {offsets = [0, 0], sizes = [3, 17], strides = [1, 1]} : vector<3x256xf32> to vector<3x17xf32>
    %67 = tpu.concatenate %65, %66 in 1 : vector<3x239xf32>, vector<3x17xf32> -> vector<3x256xf32>
    %c15_i32_17 = arith.constant 15 : i32
    %68 = vector.broadcast %c15_i32_17 : i32 to vector<3x256xi32>
    %69 = arith.cmpi slt, %4, %68 : vector<3x256xi32>
    %c15_i32_18 = arith.constant 15 : i32
    %70 = vector.broadcast %c15_i32_18 : i32 to vector<3x256xi32>
    %71 = arith.cmpi slt, %6, %70 : vector<3x256xi32>
    %72 = arith.andi %69, %71 : vector<3x256xi1>
    %cst_19 = arith.constant 0.000000e+00 : f32
    %73 = vector.broadcast %cst_19 : f32 to vector<3x256xf32>
    %74 = arith.select %72, %67, %73 : vector<3x256xi1>, vector<3x256xf32>
    %75 = tpu.concatenate %16, %23, %33, %40, %1, %47, %57, %64, %74 in 0 : vector<3x256xf32>, vector<3x256xf32>, vector<3x256xf32>, vector<3x256xf32>, vector<3x256xf32>, vector<3x256xf32>, vector<3x256xf32>, vector<3x256xf32>, vector<3x256xf32> -> vector<27x256xf32>
    %c0_20 = arith.constant 0 : index
    %c0_21 = arith.constant 0 : index
    %76 = vector.load %arg2[%c0_20, %c0_21] : memref<16x27xf32, #tpu.memory_space<vmem>>, vector<16x27xf32>
    %cst_22 = arith.constant dense<0.000000e+00> : vector<16x256xf32>
    %77 = tpu.matmul %76, %75, %cst_22 {dimension_numbers = #tpu.dot_dimension_numbers<[1], [0], [0], [1], [0, 0, 1, 1], [], []>} : vector<16x27xf32>, vector<27x256xf32>, vector<16x256xf32> -> vector<16x256xf32>
    %c0_23 = arith.constant 0 : index
    %c0_24 = arith.constant 0 : index
    %78 = vector.load %arg3[%c0_23, %c0_24] : memref<16x1xf32, #tpu.memory_space<vmem>>, vector<16x1xf32>
    %79 = vector.broadcast %78 : vector<16x1xf32> to vector<16x256xf32>
    %80 = arith.addf %77, %79 : vector<16x256xf32>
    %c0_25 = arith.constant 0 : index
    %c0_26 = arith.constant 0 : index
    %c0_27 = arith.constant 0 : index
    %81 = vector.load %arg4[%c0_25, %c0_26, %c0_27] : memref<1x16x256xf32, #tpu.memory_space<vmem>>, vector<1x16x256xf32>
    %82 = vector.shape_cast %81 : vector<1x16x256xf32> to vector<16x256xf32>
    %83 = vector.shape_cast %80 : vector<16x256xf32> to vector<1x16x256xf32>
    tpu.vector_store %arg4[%c0_25, %c0_26, %c0_27], %83 {strides = array<i32>} : memref<1x16x256xf32, #tpu.memory_space<vmem>>, vector<1x16x256xf32>,
    return
  }
  func.func @transform_0(%arg0: i32) -> (i32, i32, i32) {
    %c0_i32 = arith.constant 0 : i32
    %c0_i32_0 = arith.constant 0 : i32
    %c0_i32_1 = arith.constant 0 : i32
    return %arg0, %c0_i32, %c0_i32_0 : i32, i32, i32
  }
  func.func @transform_1(%arg0: i32) -> (i32, i32) {
    %c0_i32 = arith.constant 0 : i32
    %c0_i32_0 = arith.constant 0 : i32
    %c0_i32_1 = arith.constant 0 : i32
    return %c0_i32, %c0_i32_0 : i32, i32
  }
  func.func @transform_2(%arg0: i32) -> (i32, i32) {
    %c0_i32 = arith.constant 0 : i32
    %c0_i32_0 = arith.constant 0 : i32
    %c0_i32_1 = arith.constant 0 : i32
    return %c0_i32, %c0_i32_0 : i32, i32
  }
  func.func @transform_3(%arg0: i32) -> (i32, i32, i32) {
    %c0_i32 = arith.constant 0 : i32
    %c0_i32_0 = arith.constant 0 : i32
    %c0_i32_1 = arith.constant 0 : i32
    return %arg0, %c0_i32, %c0_i32_0 : i32, i32, i32
  }
}

</mosaic_0001>

<bundles_post_ra>
// kernel: conv2d_3x3_pallas.1
= control target key start
LH: loop header
LB: loop body
LE: loop exit
PB: predicated region body
PF: predicated region fallthrough
CT: control target
= control target key end

     0   :  { %s600_s12 = smov 0   ;;  %s781_s0 = inlined_call_operand.vmem [shape: f32[2,3,256], index: 0, kind: input, shape index: {}]   ;;  %s782_s1 = inlined_call_operand.vmem [shape: f32[16,27], index: 1, kind: input, shape index: {}]   ;;  %s783_s2 = inlined_call_operand.vmem [shape: f32[16,1], index: 2, kind: input, shape index: {}]   ;;  %s784_s3 = inlined_call_operand.vmem [shape: f32[2,16,256], index: 3, kind: output, shape index: {}]  }
   0x1 LB: > { %s515_s13 = sadd.s32 4294967295, %s568_s12   ;;  %p519_p0 = scmp.ge.s32.totalorder %s568_s12, 1  ;;  %s568_s12 = sphi %s600_s12, %s13_s12  }
   0x2   : > { %p137_p1 = scmp.lt.s32.totalorder %s568_s12, 3 }
   0x4   : > { %p138_p2 = pnand %p519_p0, %p137_p1 }
   0x5   : > { %p161_p3 = scmp.lt.s32.totalorder (!%p138_p2), %s515_s13, 1  ;;  %s570_s18 = smov (!%p138_p2), 113  }
   0x6   : > { %141 = sbr.rel (%p138_p2) target bundleno = 362 (0x16a), region = 32  ;;  %s571_s19 = smov (!%p138_p2), 127  }
   0x7   : > { %s572_s20 = smov (!%p138_p2), 15   ;;  %s573_s21 = smov (!%p138_p2), 1  }
   0x8   : > { %s574_s22 = smov (!%p138_p2), 112   ;;  %s575_s23 = smov (!%p138_p2), 111  }
   0x9   : > { %s578_s24 = smov (!%p138_p2), 16   ;;  %s579_s25 = smov (!%p138_p2), 17  }
   0xb   : > { %s814_s13 = smov (!%p161_p3, %s515_s13), 1  ;;  %v576_v2 = vmov 0.0   ;;  %v577_v3 = vmov 0   ;;  %v355_v4 = vld [vmem:[%s783_s2 + $0x8] sm:$0xff]  ;;  %v354_v5 = vld [vmem:[%s783_s2] sm:$0xff]  ;;  %v172_v6 = vlaneseq  ;;  %v790_v18 = vmov 0 }
   0xc   : > { %s530_s14 = sshll.u32 %s814_s13, 3  ;;  %443 = vmatprep.mubr.f32.mxu0 %v576_v2  ;;  %449 = vmatprep.mubr.f32.mxu1 %v576_v2  ;;  %vm785_vm2 = vcmask 1039360   ;;  %vm216_vm4 = vcmask 121856   ;;  %vm255_vm5 = vcmask 924672   ;;  %vm337_vm7 = vcmask 1040384   ;;  %s531_s7 = sshll.u32 %s814_s13, 5 }
   0xd   : > { %s165_s17 = scalar_lea.vmem %s781_s0, %s530_s14  ;;  %559 = vset.pattern.permute.xlu1 %v577_v3  ;;  %558 = vset.pattern.permute.xlu0 %v577_v3  ;;  %v173_v7 = vand.u32 127, %v172_v6  ;;  %s170_s10 = scalar_lea.vmem %s784_s3, %s531_s7 }
   0xe   : > { %v614_v0 = vld [vmem:[%s165_s17] sm:$0x77] }
   0xf   : > { %251 = vrot.lane.b32.xlu1 %v614_v0, %s570_s18  ;;  %239 = vrot.lane.b32.xlu0 %v614_v0, %s571_s19  ;;  %v180_v1 = vcombine.high %v614_v0, %v614_v0  ;;  %v174_v10 = vadd.s32 128, %v173_v7  ;;  %v175_v15 = vshra.s32 %v173_v7, 4  ;;  %v177_v16 = vand.u32 15, %v173_v7 }
  0x10   : > { %v311_v38 = vcombine.low %v614_v0, %v614_v0 }
  0x11   : > { %v176_v13 = vshra.s32 %v174_v10, 4  ;;  %v178_v14 = vand.u32 15, %v174_v10  ;;  %vm644_vm6 = vcmp.ge.s32.totalorder %v175_v15, 1  ;;  %vm648_vm8 = vcmp.lt.s32.totalorder %v177_v16, 15 }
  0x12   : > { %vm656_vm10 = vcmp.ge.s32.totalorder %v177_v16, 1  ;;  %vm660_vm11 = vcmp.lt.s32.totalorder %v175_v15, 15  ;;  %vm223_vm12 = vmand %vm644_vm6, %vm648_vm8 }
  0x13   : > { %214 = vrot.lane.b32.xlu1 %v614_v0, %s572_s20  ;;  %241 = vrot.lane.b32.xlu0 %v180_v1, %s571_s19  ;;  %vm632_vm0 = vcmp.ge.s32.totalorder %v178_v14, 1  ;;  %vm636_vm1 = vcmp.lt.s32.totalorder %v176_v13, 15  ;;  %vm640_vm3 = vcmp.ge.s32.totalorder %v176_v13, 1  ;;  %vm652_vm9 = vcmp.lt.s32.totalorder %v178_v14, 15  ;;  %vm263_vm14 = vmand %vm660_vm11, %vm656_vm10 }
  0x14   : > { %v791_v18 = vsel %vm636_vm1, 4294967295, %v790_v18  ;;  %vm224_vm13 = vmand %vm640_vm3, %vm652_vm9 }
  0x17   : > { %253 = vrot.lane.b32.xlu1 %v180_v1, %s570_s18  ;;  %211 = vrot.lane.b32.xlu0 %v180_v1, %s572_s20 }
  0x1b   : > { %230 = vrot.lane.b32.xlu1 %v614_v0, %s573_s21  ;;  %227 = vrot.lane.b32.xlu0 %v180_v1, %s573_s21 }
  0x1f   : > { %269 = vrot.lane.b32.xlu1 %v180_v1, %s574_s22  ;;  %267 = vrot.lane.b32.xlu0 %v614_v0, %s574_s22 }
  0x23   : > { %281 = vrot.lane.b32.xlu1 %v180_v1, %s575_s23  ;;  %279 = vrot.lane.b32.xlu0 %v614_v0, %s575_s23 }
  0x27   : > { %202 = vrot.lane.b32.xlu1 %v614_v0, %s578_s24  ;;  %199 = vrot.lane.b32.xlu0 %v180_v1, %s578_s24 }
  0x2b   : > { %184 = vrot.lane.b32.xlu1 %v614_v0, %s579_s25  ;;  %181 = vrot.lane.b32.xlu0 %v180_v1, %s579_s25 }
  0x2f   : > { %363 = vperm.xlu1 %559, %v355_v4   ;;  %358 = vperm.xlu0 %558, %v354_v5  }
  0x81   : > { %v252_v8 = vpop.permute.xlu1 %251  ;;  %v240_v9 = vpop.permute.xlu0 %239 }
  0x85   : > { %v215_v11 = vpop.permute.xlu1 %214  ;;  %v242_v12 = vpop.permute.xlu0 %241 }
  0x86   : > { %v248_v27 = vsel %vm785_vm2, %v242_v12, %v240_v9  ;;  %vm804_vm2 = vcmask 7168  }
  0x87   : > { %vm805_vm1 = vmmov %vm804_vm2  ;;  %v250_v41 = vsel %vm652_vm9, %v248_v27, 0.0 }
  0x88   : > { %v316_v57 = vrot.slane %v250_v41, 1 }
  0x89   : > { %v254_v19 = vpop.permute.xlu1 %253  ;;  %v212_v20 = vpop.permute.xlu0 %211 }
  0x8a   : > { %v217_v28 = vsel %vm216_vm4, %v215_v11, %v212_v20  ;;  %v260_v31 = vsel %vm255_vm5, %v254_v19, %v252_v8  ;;  %v220_v32 = vsel %vm216_vm4, %v212_v20, %v215_v11  ;;  %v256_v35 = vsel %vm255_vm5, %v252_v8, %v254_v19 }
  0x8b   : > { %vm806_vm4 = vcmask 1039360   ;;  %v699_v40 = vsel %vm224_vm13, %v217_v28, 0.0  ;;  %vm807_vm5 = vnez %v791_v18  ;;  %v708_v43 = vsel %vm223_vm12, %v220_v32, 0.0  ;;  %v352_v32 = vld [vmem:[%s782_s1] sm:$0xff] }
  0x8c   : > { %v244_v39 = vsel %vm806_vm4, %v240_v9, %v242_v12  ;;  %vm808_vm15 = vmand %vm807_vm5, %vm632_vm0  ;;  %v265_v47 = vsel %vm263_vm14, %v256_v35, 0.0  ;;  %vm809_vm13 = vcmask 916480   ;;  %v302_v51 = vrot.slane %v699_v40, 2 }
  0x8d   : > { %v231_v29 = vpop.permute.xlu1 %230  ;;  %v228_v30 = vpop.permute.xlu0 %227  ;;  %v266_v42 = vsel %vm808_vm15, %v260_v31, 0.0  ;;  %vm810_vm4 = vmmov %vm809_vm13  ;;  %vm349_vm15 = vcmask 1044480   ;;  %v249_v54 = vsel %vm648_vm8, %v244_v39, 0.0  ;;  %v301_v56 = vrot.slane %v708_v43, 2 }
  0x8e   : > { %v233_v33 = vsel %vm804_vm2, %v231_v29, %v228_v30  ;;  %v236_v34 = vsel %vm805_vm1, %v228_v30, %v231_v29  ;;  %vm283_vm1 = vcmask 908288   ;;  %vm340_vm2 = vcmask 1043456   ;;  %vm290_vm12 = vmand %vm807_vm5, %vm652_vm9 }
  0x8f   : > { %v237_v36 = vsel %vm656_vm10, %v236_v34, 0.0  ;;  %v238_v37 = vsel %vm632_vm0, %v233_v33, 0.0  ;;  %v322_v55 = vrot.slane %v266_v42, 6  ;;  %vm331_vm14 = vcmask 1042432   ;;  %v353_v33 = vld [vmem:[%s782_s1 + $0x8] sm:$0xff] }
  0x90   : > { %v308_v44 = vrot.slane %v238_v37, 7  ;;  %v307_v48 = vrot.slane %v237_v36, 7  ;;  %v321_v58 = vrot.slane %v265_v47, 6  ;;  %v315_v4 = vrot.slane %v249_v54, 1 }
  0x91   : > { %v270_v45 = vpop.permute.xlu1 %269  ;;  %v268_v46 = vpop.permute.xlu0 %267  ;;  %vm186_vm9 = vcmask 138240  }
  0x92   : > { %v272_v49 = vsel %vm809_vm13, %v268_v46, %v270_v45  ;;  %v276_v50 = vsel %vm810_vm4, %v270_v45, %v268_v46  ;;  %vm289_vm13 = vmand %vm660_vm11, %vm648_vm8  ;;  %v339_v62 = vsel %vm337_vm7, %v302_v51, %v308_v44  ;;  %v338_v3 = vsel %vm337_vm7, %v301_v56, %v307_v48 }
  0x93   : > { %v277_v52 = vsel %vm660_vm11, %v272_v49, 0.0  ;;  %v278_v53 = vsel %vm807_vm5, %v276_v50, 0.0  ;;  %vm204_vm8 = vcmask 130048   ;;  %vm811_vm11 = vcmask 1041408   ;;  %vm196_vm5 = vmand %vm640_vm3, %vm632_vm0 }
  0x94   : > { %v328_v59 = vrot.slane %v278_v53, 3  ;;  %v327_v63 = vrot.slane %v277_v52, 3  ;;  %v348_v7 = vsel %vm811_vm11, %v316_v57, %v322_v55  ;;  %v342_v8 = vsel %vm340_vm2, %v339_v62, %v614_v0  ;;  %vm812_vm7 = vmmov %vm811_vm11 }
  0x95   : > { %v282_v60 = vpop.permute.xlu1 %281  ;;  %v280_v61 = vpop.permute.xlu0 %279  ;;  %v347_v12 = vsel %vm812_vm7, %v315_v4, %v321_v58  ;;  %v341_v13 = vsel %vm340_vm2, %v338_v3, %v311_v38  ;;  %vm195_vm2 = vmand %vm644_vm6, %vm656_vm10  ;;  %vm334_vm4 = vcmask 1045504   ;;  %vm366_vm0 = vcmask 220160  }
  0x96   : > { %v284_v1 = vsel %vm283_vm1, %v280_v61, %v282_v60  ;;  %v288_v2 = vsel %vm283_vm1, %v282_v60, %v280_v61  ;;  %vm343_vm1 = vcmask 1046528   ;;  %v351_v11 = vsel %vm349_vm15, %v348_v7, %v328_v59 }
  0x97   : > { %v292_v5 = vsel %vm290_vm12, %v288_v2, 0.0  ;;  %v291_v6 = vsel %vm289_vm13, %v284_v1, 0.0  ;;  %v350_v16 = vsel %vm349_vm15, %v347_v12, %v327_v63  ;;  %v345_v19 = vsel %vm343_vm1, %v342_v8, %v316_v57 }
  0x98   : > { %524 = vmatprep.subr.msk.mxu0 %vm331_vm14, %v292_v5  ;;  %532 = vmatprep.subr.msk.mxu1 %vm331_vm14, %v292_v5  ;;  %v344_v20 = vsel %vm343_vm1, %v341_v13, %v315_v4 }
  0x99   : > { %v203_v9 = vpop.permute.xlu1 %202  ;;  %525 = vmatpush1.msk.msra.mxu0 %vm331_vm14, %v291_v6  ;;  %536 = vmatpush1.msk.msra.mxu1 %vm331_vm14, %v291_v6  ;;  %v200_v10 = vpop.permute.xlu0 %199 }
  0x9a   : > { %v205_v14 = vsel %vm204_vm8, %v203_v9, %v200_v10  ;;  %v208_v15 = vsel %vm204_vm8, %v200_v10, %v203_v9  ;;  %405 = vmatprep.subr.mxu0 %v351_v11  ;;  %533 = vmatprep.subr.mxu1 %v351_v11 }
  0x9b   : > { %v209_v0 = vsel %vm644_vm6, %v208_v15, 0.0  ;;  %v210_v18 = vsel %vm640_vm3, %v205_v14, 0.0  ;;  %406 = vmatpush1.msra.mxu0 %v350_v16  ;;  %537 = vmatpush1.msra.mxu1 %v350_v16 }
  0x9c   : > { %407 = vmatprep.subr.mxu0 %v345_v19  ;;  %534 = vmatprep.subr.mxu1 %v345_v19  ;;  %v295_v26 = vrot.slane %v209_v0, 5  ;;  %v296_v27 = vrot.slane %v210_v18, 5 }
  0x9d   : > { %v185_v23 = vpop.permute.xlu1 %184  ;;  %408 = vmatpush1.msra.mxu0 %v344_v20  ;;  %538 = vmatpush1.msra.mxu1 %v344_v20  ;;  %v182_v24 = vpop.permute.xlu0 %181 }
  0x9e   : > { %v187_v25 = vsel %vm186_vm9, %v185_v23, %v182_v24  ;;  %v190_v28 = vsel %vm186_vm9, %v182_v24, %v185_v23 }
  0x9f   : > { %v197_v22 = vsel %vm195_vm2, %v190_v28, 0.0  ;;  %v198_v29 = vsel %vm196_vm5, %v187_v25, 0.0 }
  0xa0   : > { %v333_v30 = vsel %vm331_vm14, %v198_v29, %v296_v27  ;;  %v332_v31 = vsel %vm331_vm14, %v197_v22, %v295_v26 }
  0xa1   : > { %v336_v17 = vsel %vm334_vm4, %v333_v30, %v302_v51  ;;  %v335_v21 = vsel %vm334_vm4, %v332_v31, %v301_v56 }
  0xa2   : > { %409 = vmatprep.subr.mxu0 %v336_v17  ;;  %535 = vmatprep.subr.mxu1 %v336_v17 }
  0xa3   : > { %410 = vmatpush1.msra.mxu0 %v335_v21  ;;  %539 = vmatpush1.msra.mxu1 %v335_v21 }
  0xa4   : > { %526 = vmatmul.mubr.msk.f32.vlgmr.msra.gmra.mxu0 %vm366_vm0, %v352_v32  ;;  %527 = vmatmul.mubr.msk.f32.vlgmr.msra.gmra.mxu1 %vm366_vm0, %v353_v33 }
  0xaa   : > { %v364_v34 = vpop.permute.xlu1 %363  ;;  %v359_v35 = vpop.permute.xlu0 %358 }
 0x164   : > { %v445_v36 = vpop.f32.mrf.mxu0  ;;  %v451_v37 = vpop.f32.mrf.mxu1 }
 0x165   : > { %v452_v38 = vadd.f32 %v451_v37, %v364_v34  ;;  %v446_v39 = vadd.f32 %v445_v36, %v359_v35 }
 0x166   : > { %v447_v40 = vpop.f32.mrf.mxu0  ;;  %v453_v41 = vpop.f32.mrf.mxu1 }
 0x167   : > { %458 = vst [vmem:[%s170_s10 + $0x10] sm:$0xff] %v452_v38  ;;  %456 = vst [vmem:[%s170_s10] sm:$0xff] %v446_v39  ;;  %v448_v42 = vadd.f32 %v447_v40, %v359_v35  ;;  %v454_v43 = vadd.f32 %v453_v41, %v364_v34 }
 0x169   : > { %457 = vst [vmem:[%s170_s10 + $0x8] sm:$0xff] %v448_v42  ;;  %459 = vst [vmem:[%s170_s10 + $0x18] sm:$0xff] %v454_v43 }
 0x16a PF: > { %s13_s12 = sadd.s32 1, %s568_s12  }
 0x16b   : > { %p10_p4 = scmp.ge.s32.totalorder %s13_s12, 4  }
 0x16d   :  { %12 = sbr.rel (!%p10_p4) target bundleno = 1 (0x1), region = 62 }

</bundles_post_ra>
